<compile_context>
chip_gen: v7x
topology: tpu7x:2x2x1
jax: 0.10.0
libtpu: 0.0.40
codegen_flags: <defaults>
</compile_context>

<pallas_src>
import jax
import jax.numpy as jnp
from jax.experimental import pallas as pl
from jax.experimental.pallas import tpu as pltpu


def attention_pooling_kernel(x_ref, w_ref, b_ref, v_ref, o_ref,
                             m_sc, l_sc, acc_sc):
    # x_ref: (TB, TS, D)  w_ref: (D, H)  b_ref: (1, H)  v_ref: (1, H)
    # o_ref: (TB, D)
    # scratch (f32 VMEM): m_sc (TB,1) running max, l_sc (TB,1) running sum,
    #                     acc_sc (TB,D) running weighted-x accumulator.
    s_idx = pl.program_id(1)

    @pl.when(s_idx == 0)
    def _init():
        m_sc[...] = jnp.full_like(m_sc, -jnp.inf)
        l_sc[...] = jnp.zeros_like(l_sc)
        acc_sc[...] = jnp.zeros_like(acc_sc)

    x = x_ref[...]                                   # (TB, TS, D) native dtype
    tb, ts, d = x.shape
    h = w_ref.shape[1]

    # Projection: flatten to a rank-2 MXU matmul in the native dtype, f32
    # accumulation; only the tiny (1, H) bias is cast up.
    x2 = x.reshape(tb * ts, d)
    proj = jnp.tanh(
        jnp.dot(x2, w_ref[...], preferred_element_type=jnp.float32)
        + b_ref[...].astype(jnp.float32))            # (TB*TS, H) f32

    # scores = proj @ v as a VPU multiply + lane reduce, laid out lane-dense
    # as (TB, TS) so the online-softmax exp/max/sum touch full vregs.
    proj3 = proj.reshape(tb, ts, h)
    scores = jnp.sum(proj3 * v_ref[...].astype(jnp.float32),
                     axis=-1)                        # (TB, TS)

    # Online softmax over sequence chunks (lane-dense statistics).
    m_prev = m_sc[...]                               # (TB, 1)
    m_new = jnp.maximum(m_prev, jnp.max(scores, axis=-1, keepdims=True))
    alpha = jnp.exp(m_prev - m_new)                  # (TB, 1)
    p = jnp.exp(scores - m_new)                      # (TB, TS)
    l_sc[...] = alpha * l_sc[...] + jnp.sum(p, axis=-1, keepdims=True)

    # Weighted chunk sum on the MXU: per batch row (1, TS) @ (TS, D).
    p3 = p.reshape(tb, 1, ts).astype(x.dtype)
    wsum = jnp.einsum('bqs,bsd->bqd', p3, x,
                      preferred_element_type=jnp.float32)   # (TB, 1, D)
    acc_sc[...] = alpha * acc_sc[...] + wsum[:, 0, :]
    m_sc[...] = m_new

    @pl.when(s_idx == pl.num_programs(1) - 1)
    def _finalize():
        # Exact division (once per output tile). The approximate reciprocal
        # used previously was the source of the correctness failure.
        o_ref[...] = (acc_sc[...] / l_sc[...]).astype(o_ref.dtype)


def attention_pooling(x, w, b, v, *, tb=None, ts=None,
                      vmem_budget_bytes=24 * 1024 * 1024):
    """x: (B, S, D); w: (D, H); b: (H,); v: (H,) -> (B, D)."""
    B, S, D = x.shape
    H = w.shape[1]
    itemsize = jnp.dtype(x.dtype).itemsize

    # Batch tile: multiple of 8 so the (TB, D) output slab is a dense
    # (8, 128)-aligned store; prefer >= 2 grid steps on the parallel batch
    # axis so both v7x TensorCores get work.
    if tb is None:
        tb = B
        for cand in (32, 16, 8):
            if B % cand == 0 and B // cand >= 2:
                tb = cand
                break
        else:
            for cand in (32, 16, 8):
                if B % cand == 0:
                    tb = cand
                    break

    # Sequence chunk: VMEM-budget-driven (double-buffered x tile + in-kernel
    # f32 proj/scores/p working set). Default budget ~24 MiB — conservative
    # for v7x's 64 MiB VMEM per TensorCore; well under v5e/v6e limits.
    if ts is None:
        fixed = (2 * D * H * itemsize            # w double buffer
                 + 4 * H * itemsize              # b, v
                 + 2 * tb * D * itemsize         # output double buffer
                 + tb * D * 4 + 2 * tb * 4)      # f32 scratch accumulators
        avail = max(vmem_budget_bytes - fixed, 1 << 20)
        per_row = tb * (2 * D * itemsize         # x double buffer
                        + D * itemsize           # einsum operand / wsum
                        + H * 4 + 16)            # f32 proj + scores/p
        ts_max = max(avail // per_row, 8)
        limit = int(min(ts_max, S))
        cand = (limit // 8) * 8
        ts = None
        while cand >= 8:
            if S % cand == 0:
                ts = cand
                break
            cand -= 8
        if ts is None:
            # TODO(synk): S not a multiple of 8 — single full-S chunk; the
            # in-kernel reshape may materialize one extra VMEM copy.
            ts = S

    assert B % tb == 0, "tb must divide B"
    assert S % ts == 0, "ts must divide S"
    assert tb == B or tb % 8 == 0, "tb must be a multiple of 8 (or == B)"
    assert ts == S or ts % 8 == 0, "ts must be a multiple of 8 (or == S)"

    b2 = b.reshape(1, H)
    v2 = v.reshape(1, H)
    grid = (B // tb, S // ts)

    # Scoped-VMEM limit: cover the working set with headroom, but stay within
    # v7x's 64 MiB physical VMEM (also raises v5e's 16 MiB scoped default).
    vmem_est = (2 * tb * ts * D * itemsize + 2 * D * H * itemsize
                + 4 * H * itemsize + 2 * tb * D * itemsize
                + tb * D * 4 + 2 * tb * 4
                + tb * ts * (H + 8) * 4)
    vmem_limit = int(min(max(2 * vmem_est, 32 * 1024 * 1024),
                         64 * 1024 * 1024))

    return pl.pallas_call(
        attention_pooling_kernel,
        out_shape=jax.ShapeDtypeStruct((B, D), x.dtype),
        grid_spec=pltpu.PrefetchScalarGridSpec(
            num_scalar_prefetch=0,
            grid=grid,
            in_specs=[
                pl.BlockSpec((tb, ts, D), lambda i, j: (i, j, 0)),
                pl.BlockSpec((D, H), lambda i, j: (0, 0)),
                pl.BlockSpec((1, H), lambda i, j: (0, 0)),
                pl.BlockSpec((1, H), lambda i, j: (0, 0)),
            ],
            out_specs=pl.BlockSpec((tb, D), lambda i, j: (i, 0)),
            scratch_shapes=[
                pltpu.VMEM((tb, 1), jnp.float32),   # running max  m
                pltpu.VMEM((tb, 1), jnp.float32),   # running sum  l
                pltpu.VMEM((tb, D), jnp.float32),   # running weighted x
            ],
        ),
        compiler_params=pltpu.CompilerParams(
            # batch axis megacore-parallel, sequence axis is the
            # online-softmax reduction -> "arbitrary".
            dimension_semantics=("parallel", "arbitrary"),
            vmem_limit_bytes=vmem_limit,
        ),
        cost_estimate=pl.CostEstimate(
            flops=2 * B * S * D * H + 2 * B * S * H + 2 * B * S * D,
            transcendentals=B * S * (H + 1),
            bytes_accessed=(B * S * D + B * D) * itemsize
            + (D * H + 2 * H) * jnp.dtype(w.dtype).itemsize,
        ),
    )(x, w, b2, v2)


def attention_pooling_ref(x, w, b, v):
    """Pure-JAX reference mirroring the PyTorch forward (mask=None)."""
    x_proj = jnp.tanh(jnp.einsum("bsd,dh->bsh", x, w) + b)
    scores = jnp.einsum("bsh,h->bs", x_proj, v)
    weights = jax.nn.softmax(scores, axis=1)
    return jnp.sum(x * weights[..., None], axis=1)


if __name__ == "__main__":
    # Small but tile-friendly shapes: D_in = 128 lanes, B = 16 so batch rows
    # stack into full (8, 128) output tiles, S = 64 chunked into ts = 16 so
    # the multi-chunk online-softmax path is exercised.
    B, S, D_in, H = 16, 64, 128, 32

    key = jax.random.PRNGKey(0)
    kx, kw, kb, kv = jax.random.split(key, 4)

    x = jax.random.normal(kx, (B, S, D_in), dtype=jnp.float32)
    # nn.Linear(input_dim, hidden_dim): weight (H, D_in), bias (H,)
    w_t = jax.random.normal(kw, (H, D_in), dtype=jnp.float32) * 0.1
    b = jax.random.normal(kb, (H,), dtype=jnp.float32) * 0.1
    v = jax.random.normal(kv, (H,), dtype=jnp.float32)  # torch.randn(hidden)

    w = w_t.T  # (D_in, H), so kernel computes x @ W == Linear(x)

    ref = attention_pooling_ref(x, w, b, v)

    # Explicit small tiles: exercises the multi-chunk online-softmax path.
    out = jax.block_until_ready(attention_pooling(x, w, b, v, tb=8, ts=16))
    assert out.shape == (B, D_in)
    err = float(jnp.max(jnp.abs(out - ref)))
    assert err < 1e-3, f"mismatch (explicit tiles): max abs err {err}"

    # Auto (VMEM-budget-driven) tiles.
    out2 = jax.block_until_ready(attention_pooling(x, w, b, v))
    err2 = float(jnp.max(jnp.abs(out2 - ref)))
    assert err2 < 1e-3, f"mismatch (auto tiles): max abs err {err2}"

    print("KERNEL_OK")
</pallas_src>

<mosaic_0001>
module attributes {stable_mosaic.version = 11 : i64} {
  func.func @attention_pooling_kernel(%arg0: i32, %arg1: i32, %arg2: memref<8x16x128xf32, #tpu.memory_space<vmem>>, %arg3: memref<128x32xf32, #tpu.memory_space<vmem>>, %arg4: memref<1x32xf32, #tpu.memory_space<vmem>>, %arg5: memref<1x32xf32, #tpu.memory_space<vmem>>, %arg6: memref<8x128xf32, #tpu.memory_space<vmem>>, %arg7: memref<8x1xf32, #tpu.memory_space<vmem>>, %arg8: memref<8x1xf32, #tpu.memory_space<vmem>>, %arg9: memref<8x128xf32, #tpu.memory_space<vmem>>) attributes {dimension_semantics = [#tpu.dimension_semantics<parallel>, #tpu.dimension_semantics<arbitrary>], iteration_bounds = array<i64: 2, 4>, scalar_prefetch = 0 : i64, scratch_operands = 3 : i64, tpu.core_type = #tpu.core_type<tc>, window_params = [{transform_indices = @transform_0, window_bounds = array<i64: 8, 16, 128>}, {pipeline_mode = #tpu.pipeline_mode<synchronous>, transform_indices = @transform_1, window_bounds = array<i64: 128, 32>}, {pipeline_mode = #tpu.pipeline_mode<synchronous>, transform_indices = @transform_2, window_bounds = array<i64: 1, 32>}, {pipeline_mode = #tpu.pipeline_mode<synchronous>, transform_indices = @transform_3, window_bounds = array<i64: 1, 32>}, {transform_indices = @transform_4, window_bounds = array<i64: 8, 128>}]} {
    %c0_i32 = arith.constant 0 : i32
    %0 = arith.cmpi eq, %arg1, %c0_i32 : i32
    %1 = arith.extui %0 : i1 to i32
    %c0_i32_0 = arith.constant 0 : i32
    %2 = arith.cmpi ne, %1, %c0_i32_0 : i32
    scf.if %2 {
      %cst_26 = arith.constant 0xFF800000 : f32
      %44 = vector.broadcast %cst_26 : f32 to vector<8x1xf32>
      %c0_27 = arith.constant 0 : index
      %c0_28 = arith.constant 0 : index
      %45 = vector.load %arg7[%c0_27, %c0_28] : memref<8x1xf32, #tpu.memory_space<vmem>>, vector<8x1xf32>
      tpu.vector_store %arg7[%c0_27, %c0_28], %44 {strides = array<i32>} : memref<8x1xf32, #tpu.memory_space<vmem>>, vector<8x1xf32>,
      %cst_29 = arith.constant 0.000000e+00 : f32
      %46 = vector.broadcast %cst_29 : f32 to vector<8x1xf32>
      %c0_30 = arith.constant 0 : index
      %c0_31 = arith.constant 0 : index
      %47 = vector.load %arg8[%c0_30, %c0_31] : memref<8x1xf32, #tpu.memory_space<vmem>>, vector<8x1xf32>
      tpu.vector_store %arg8[%c0_30, %c0_31], %46 {strides = array<i32>} : memref<8x1xf32, #tpu.memory_space<vmem>>, vector<8x1xf32>,
      %cst_32 = arith.constant 0.000000e+00 : f32
      %48 = vector.broadcast %cst_32 : f32 to vector<8x128xf32>
      %c0_33 = arith.constant 0 : index
      %c0_34 = arith.constant 0 : index
      %49 = vector.load %arg9[%c0_33, %c0_34] : memref<8x128xf32, #tpu.memory_space<vmem>>, vector<8x128xf32>
      tpu.vector_store %arg9[%c0_33, %c0_34], %48 {strides = array<i32>} : memref<8x128xf32, #tpu.memory_space<vmem>>, vector<8x128xf32>,
    } else {
    }
    %c0 = arith.constant 0 : index
    %c0_1 = arith.constant 0 : index
    %c0_2 = arith.constant 0 : index
    %3 = vector.load %arg2[%c0, %c0_1, %c0_2] : memref<8x16x128xf32, #tpu.memory_space<vmem>>, vector<8x16x128xf32>
    %4 = vector.shape_cast %3 : vector<8x16x128xf32> to vector<128x128xf32>
    %c0_3 = arith.constant 0 : index
    %c0_4 = arith.constant 0 : index
    %5 = vector.load %arg3[%c0_3, %c0_4] : memref<128x32xf32, #tpu.memory_space<vmem>>, vector<128x32xf32>
    %cst = arith.constant dense<0.000000e+00> : vector<128x32xf32>
    %6 = tpu.matmul %4, %5, %cst {dimension_numbers = #tpu.dot_dimension_numbers<[1], [0], [0], [1], [0, 0, 1, 1], [], []>} : vector<128x128xf32>, vector<128x32xf32>, vector<128x32xf32> -> vector<128x32xf32>
    %c0_5 = arith.constant 0 : index
    %c0_6 = arith.constant 0 : index
    %7 = vector.load %arg4[%c0_5, %c0_6] : memref<1x32xf32, #tpu.memory_space<vmem>>, vector<1x32xf32>
    %8 = vector.broadcast %7 : vector<1x32xf32> to vector<128x32xf32>
    %9 = arith.addf %6, %8 : vector<128x32xf32>
    %10 = math.tanh %9 : vector<128x32xf32>
    %11 = vector.shape_cast %10 : vector<128x32xf32> to vector<8x16x32xf32>
    %c0_7 = arith.constant 0 : index
    %c0_8 = arith.constant 0 : index
    %12 = vector.load %arg5[%c0_7, %c0_8] : memref<1x32xf32, #tpu.memory_space<vmem>>, vector<1x32xf32>
    %13 = vector.shape_cast %12 : vector<1x32xf32> to vector<1x1x32xf32>
    %14 = vector.broadcast %13 : vector<1x1x32xf32> to vector<8x16x32xf32>
    %15 = arith.mulf %11, %14 : vector<8x16x32xf32>
    %cst_9 = arith.constant dense<0.000000e+00> : vector<8x16xf32>
    %16 = vector.multi_reduction <add>, %15, %cst_9 [2] : vector<8x16x32xf32> to vector<8x16xf32>
    %c0_10 = arith.constant 0 : index
    %c0_11 = arith.constant 0 : index
    %17 = vector.load %arg7[%c0_10, %c0_11] : memref<8x1xf32, #tpu.memory_space<vmem>>, vector<8x1xf32>
    %cst_12 = arith.constant dense<0xFF800000> : vector<8xf32>
    %18 = vector.multi_reduction <maximumf>, %16, %cst_12 [1] : vector<8x16xf32> to vector<8xf32>
    %19 = vector.shape_cast %18 : vector<8xf32> to vector<8x1xf32>
    %20 = arith.maximumf %17, %19 : vector<8x1xf32>
    %21 = arith.subf %17, %20 : vector<8x1xf32>
    %22 = math.exp %21 : vector<8x1xf32>
    %23 = vector.broadcast %20 : vector<8x1xf32> to vector<8x16xf32>
    %24 = arith.subf %16, %23 : vector<8x16xf32>
    %25 = math.exp %24 : vector<8x16xf32>
    %c0_13 = arith.constant 0 : index
    %c0_14 = arith.constant 0 : index
    %26 = vector.load %arg8[%c0_13, %c0_14] : memref<8x1xf32, #tpu.memory_space<vmem>>, vector<8x1xf32>
    %27 = arith.mulf %22, %26 : vector<8x1xf32>
    %cst_15 = arith.constant dense<0.000000e+00> : vector<8xf32>
    %28 = vector.multi_reduction <add>, %25, %cst_15 [1] : vector<8x16xf32> to vector<8xf32>
    %29 = vector.shape_cast %28 : vector<8xf32> to vector<8x1xf32>
    %30 = arith.addf %27, %29 : vector<8x1xf32>
    %c0_16 = arith.constant 0 : index
    %c0_17 = arith.constant 0 : index
    %31 = vector.load %arg8[%c0_16, %c0_17] : memref<8x1xf32, #tpu.memory_space<vmem>>, vector<8x1xf32>
    tpu.vector_store %arg8[%c0_16, %c0_17], %30 {strides = array<i32>} : memref<8x1xf32, #tpu.memory_space<vmem>>, vector<8x1xf32>,
    %32 = vector.shape_cast %25 : vector<8x16xf32> to vector<8x1x16xf32>
    "tpu.trace_start"() <{level = 10 : i32, message = "bqs,bsd->bqd"}> : () -> ()
    %cst_18 = arith.constant dense<0.000000e+00> : vector<8x1x128xf32>
    %33 = tpu.matmul %32, %3, %cst_18 {dimension_numbers = #tpu.dot_dimension_numbers<[2], [1], [1], [2], [0, 0, 0, 1, 1, 2], [0], [0]>} : vector<8x1x16xf32>, vector<8x16x128xf32>, vector<8x1x128xf32> -> vector<8x1x128xf32>
    "tpu.trace_stop"() : () -> ()
    %c0_19 = arith.constant 0 : index
    %c0_20 = arith.constant 0 : index
    %34 = vector.load %arg9[%c0_19, %c0_20] : memref<8x128xf32, #tpu.memory_space<vmem>>, vector<8x128xf32>
    %35 = vector.broadcast %22 : vector<8x1xf32> to vector<8x128xf32>
    %36 = arith.mulf %35, %34 : vector<8x128xf32>
    %37 = vector.shape_cast %33 : vector<8x1x128xf32> to vector<8x128xf32>
    %38 = arith.addf %36, %37 : vector<8x128xf32>
    %c0_21 = arith.constant 0 : index
    %c0_22 = arith.constant 0 : index
    %39 = vector.load %arg9[%c0_21, %c0_22] : memref<8x128xf32, #tpu.memory_space<vmem>>, vector<8x128xf32>
    tpu.vector_store %arg9[%c0_21, %c0_22], %38 {strides = array<i32>} : memref<8x128xf32, #tpu.memory_space<vmem>>, vector<8x128xf32>,
    %c0_23 = arith.constant 0 : index
    %c0_24 = arith.constant 0 : index
    %40 = vector.load %arg7[%c0_23, %c0_24] : memref<8x1xf32, #tpu.memory_space<vmem>>, vector<8x1xf32>
    tpu.vector_store %arg7[%c0_23, %c0_24], %20 {strides = array<i32>} : memref<8x1xf32, #tpu.memory_space<vmem>>, vector<8x1xf32>,
    %c3_i32 = arith.constant 3 : i32
    %41 = arith.cmpi eq, %arg1, %c3_i32 : i32
    %42 = arith.extui %41 : i1 to i32
    %c0_i32_25 = arith.constant 0 : i32
    %43 = arith.cmpi ne, %42, %c0_i32_25 : i32
    scf.if %43 {
      %c0_26 = arith.constant 0 : index
      %c0_27 = arith.constant 0 : index
      %44 = vector.load %arg9[%c0_26, %c0_27] : memref<8x128xf32, #tpu.memory_space<vmem>>, vector<8x128xf32>
      %c0_28 = arith.constant 0 : index
      %c0_29 = arith.constant 0 : index
      %45 = vector.load %arg8[%c0_28, %c0_29] : memref<8x1xf32, #tpu.memory_space<vmem>>, vector<8x1xf32>
      %46 = vector.broadcast %45 : vector<8x1xf32> to vector<8x128xf32>
      %47 = arith.divf %44, %46 : vector<8x128xf32>
      %c0_30 = arith.constant 0 : index
      %c0_31 = arith.constant 0 : index
      %48 = vector.load %arg6[%c0_30, %c0_31] : memref<8x128xf32, #tpu.memory_space<vmem>>, vector<8x128xf32>
      tpu.vector_store %arg6[%c0_30, %c0_31], %47 {strides = array<i32>} : memref<8x128xf32, #tpu.memory_space<vmem>>, vector<8x128xf32>,
    } else {
    }
    return
  }
  func.func @transform_0(%arg0: i32, %arg1: i32) -> (i32, i32, i32) {
    %c0_i32 = arith.constant 0 : i32
    %c0_i32_0 = arith.constant 0 : i32
    return %arg0, %arg1, %c0_i32 : i32, i32, i32
  }
  func.func @transform_1(%arg0: i32, %arg1: i32) -> (i32, i32) {
    %c0_i32 = arith.constant 0 : i32
    %c0_i32_0 = arith.constant 0 : i32
    %c0_i32_1 = arith.constant 0 : i32
    return %c0_i32, %c0_i32_0 : i32, i32
  }
  func.func @transform_2(%arg0: i32, %arg1: i32) -> (i32, i32) {
    %c0_i32 = arith.constant 0 : i32
    %c0_i32_0 = arith.constant 0 : i32
    %c0_i32_1 = arith.constant 0 : i32
    return %c0_i32, %c0_i32_0 : i32, i32
  }
  func.func @transform_3(%arg0: i32, %arg1: i32) -> (i32, i32) {
    %c0_i32 = arith.constant 0 : i32
    %c0_i32_0 = arith.constant 0 : i32
    %c0_i32_1 = arith.constant 0 : i32
    return %c0_i32, %c0_i32_0 : i32, i32
  }
  func.func @transform_4(%arg0: i32, %arg1: i32) -> (i32, i32) {
    %c0_i32 = arith.constant 0 : i32
    %c0_i32_0 = arith.constant 0 : i32
    return %arg0, %c0_i32 : i32, i32
  }
}

</mosaic_0001>

<bundles_post_ra>
// kernel: tpu_custom_call.1
= control target key start
LH: loop header
LB: loop body
LE: loop exit
PB: predicated region body
PF: predicated region fallthrough
CT: control target
= control target key end

     0   :  { %9 = vsyncpa [#allocation6], 0  ;;  %s2855_s0 = inlined_call_operand.hbm [shape: f32[16,64,128], index: 0, kind: input, shape index: {}]   ;;  %s2856_s1 = inlined_call_operand.vmem [shape: f32[128,32], index: 1, kind: input, shape index: {}]   ;;  %s2857_s2 = inlined_call_operand.vmem [shape: f32[1,32], index: 2, kind: input, shape index: {}]   ;;  %s2858_s3 = inlined_call_operand.vmem [shape: f32[1,32], index: 3, kind: input, shape index: {}]   ;;  %s2859_s4 = inlined_call_operand.hbm [shape: f32[16,128], index: 4, kind: output, shape index: {}]  }
   0x1   :  { %11 = vsyncpa [#allocation6 + $0x1], 0 }
   0x2   :  { %12 = vsyncpa [#allocation7], 0 }
   0x3   :  { %14 = vsyncpa [#allocation7 + $0x1], 0  ;;  %s2227_s15 = smov 0   ;;  %s2229_s16 = smov 0  }
   0x4   :  { %s2231_s17 = smov 0   ;;  %s2233_s18 = smov 0  }
   0x5   :  { %s2235_s19 = smov 0   ;;  %s2237_s20 = smov 0  }
   0x6   :  { %s2239_s21 = smov 0   ;;  %s2241_s22 = smov 0  }
   0x7   :  { %s2243_s23 = smov 0   ;;  %s2245_s24 = smov 0  }
   0x8   :  { %s2247_s25 = smov 0  }
   0x9 LB: > { %2864 = sst [smem:[#allocation14_spill]] %s2178_s23  ;;  %s1621_s26 = sadd.s32 4294967295, %s2186_s25   ;;  %s2186_s25 = sphi %s2247_s25, %s20_s25   ;;  %s2182_s24 = sphi %s2245_s24, %s2879_s24   ;;  %s2178_s23 = sphi %s2243_s23, %s2878_s23   ;;  %s2174_s22 = sphi %s2241_s22, %s2877_s22   ;;  %s2170_s21 = sphi %s2239_s21, %s2876_s21   ;;  %s2166_s20 = sphi %s2237_s20, %s2885_s20   ;;  %s2162_s19 = sphi %s2235_s19, %s2884_s19   ;;  %s2158_s18 = sphi %s2233_s18, %s2883_s18   ;;  %s2154_s17 = sphi %s2231_s17, %s2882_s17   ;;  %s2150_s16 = sphi %s2229_s16, %s2881_s16   ;;  %s2146_s15 = sphi %s2227_s15, %s2880_s15  }
   0xa   : > { %2865 = sst [smem:[#allocation15_spill]] %s2182_s24  ;;  %s1622_s27 = sadd.s32 4294967294, %s2186_s25  }
   0xb   : > { %s29_s28 = sadd.s32 1, %s2178_s23  ;;  %s32_s29 = sadd.s32 1, %s2182_s24 }
   0xc   : > { %p30_p0 = scmp.ge.s32.totalorder %s29_s28, 4  ;;  %s41_s30 = sadd.s32 1, %s2166_s20 }
   0xd   : > { %p48_p1 = scmp.ne.s32.totalorder %s2166_s20, %s2162_s19  ;;  %p49_p2 = scmp.eq.s32.totalorder %s2186_s25, 0 }
   0xe   : > { %s2887_s28 = smov (%p30_p0, %s29_s28), 0  ;;  %s2889_s29 = smov (!%p30_p0, %s32_s29), %s2182_s24 }
   0xf   : > { %2866 = sst [smem:[#allocation16_spill]] %s2887_s28  ;;  %s37_s5 = ssub.s32 %s2178_s23, %s2887_s28 }
  0x10   : > { %p2293_p3 = por %p49_p2, %p48_p1  ;;  %p34_p4 = scmp.ge.s32.totalorder %s2889_s29, 2 }
  0x11   : > { %p54_p5 = scmp.ne.s32.totalorder %s2162_s19, %s2158_s18  ;;  %p55_p6 = scmp.eq.s32.totalorder %s1621_s26, 0 }
  0x12   : > { %s130_s7 = sadd.s32 1, %s2154_s17  ;;  %s2891_s29 = smov (%p34_p4, %s2889_s29), 0 }
  0x13   : > { %2868 = sst [smem:[#allocation17_spill]] %s2891_s29  ;;  %p2301_p7 = por %p55_p6, %p54_p5 }
  0x14   : > { %p140_p8 = scmp.ne.s32.totalorder %s2154_s17, %s2150_s16  ;;  %s36_s9 = ssub.s32 %s2182_s24, %s2891_s29 }
  0x15   : > { %p141_p9 = scmp.eq.s32.totalorder %s1621_s26, 7  ;;  %s38_s10 = sor.u32 %s37_s5, %s36_s9 }
  0x16   : > { %p128_p10 = scmp.eq.s32.totalorder %s36_s9, 0  ;;  %p39_p11 = scmp.eq.s32.totalorder %s38_s10, 0 }
  0x17   : > { %p2309_p12 = por %p141_p9, %p140_p8  ;;  %p146_p13 = scmp.ne.s32.totalorder %s2150_s16, %s2146_s15 }
  0x18   : > { %s2314_s12 = scalar_select %p128_p10, %s2154_s17, %s130_s7  }
  0x19   : > { %s2317_s13 = scalar_select %p39_p11, %s2166_s20, %s41_s30  }
  0x1a   : > { %2871 = sst [smem:[#allocation18_spill]] %s2314_s12  ;;  %p147_p0 = scmp.eq.s32.totalorder %s1622_s27, 7 }
  0x1b   : > { %2872 = sst [smem:[#allocation19_spill]] %s2317_s13  ;;  %p1624_p2 = scmp.ge.s32.totalorder %s2186_s25, 8 }
  0x1c   : > { %p2321_p1 = por %p147_p0, %p146_p13 }
  0x1d   : > { %172 = sbr.rel (%p1624_p2) target bundleno = 52 (0x34), region = 28 }
  0x24   : > { %s176_s18 = sand.u32 1, %s2166_s20   ;;  %s1627_s26 = sshll.u32 %s2178_s23, 1 }
  0x25   : > { %s1625_s30 = sshll.u32 %s176_s18, 7  ;;  %s1651_s5 = sshll.u32 %s2182_s24, 6 }
  0x26   : > { %s187_s27 = sadd.s32 %s1651_s5, %s1627_s26  ;;  %s180_s7 = scalar_lea.vmem [#allocation5], %s1625_s30 }
  0x27   : > { %s202_s9 = sshll.u32 %s180_s7, 4  ;;  %s1629_s10 = sshll.u32 %s187_s27, 7  ;;  %s203_s9 = int_to_ptr.vmem [resolvable:$true] %s202_s9 }
  0x28   : > { %s1876_s29 = scalar_select %p2293_p3, [#allocation0], [#allocation11] }
  0x29   : > { %s2188_s28 = smov 1024   ;;  %s2189_s12 = smov 256  }
  0x2a   : > { %1877 = sst [smem:[#allocation10]] (%p2293_p3), %s2188_s28  ;;  %s2190_s23 = smov 2  }
  0x2b   : > { %s194_s13 = sld [smem:[%s1876_s29]]   ;;  %s2191_s26 = smov 128  }
  0x2c   : > { %1878 = sst [smem:[#allocation10 + $0x1]] (%p2293_p3), %s2189_s12  ;;  %s189_s27 = scalar_lea.hbm %s2855_s0, %s1629_s10 }
  0x2d   : > { %1879 = sst [smem:[#allocation10 + $0x2]] (%p2293_p3), %s2190_s23  ;;  %s2192_s7 = smov 8  }
  0x2e   : > { %1880 = sst [smem:[#allocation10 + $0x3]] (%p2293_p3), %s2191_s26  ;;  %s177_s24 = scalar_lea.sflag [#allocation6], %s176_s18 }
  0x2f   : > { %1881 = sst [smem:[#allocation10 + $0x4]] (%p2293_p3), %s2191_s26  ;;  %s2193_s12 = smov [#allocation9]  }
  0x30   : > { %1882 = sst [smem:[#allocation10 + $0x5]] (%p2293_p3), %s2192_s7 }
  0x31   : > { %s1630_s28 = sshll.u32 %s194_s13, 26 }
  0x32   : > { %s1631_s29 = sadd.s32 134217728, %s1630_s28 }
  0x33   : > { %1883 = dma.general (%p2293_p3), %s189_s27, 2048, %s203_s9, %s177_s24, %s2193_s12, [#allocation10], %s1631_s29, 0  }
  0x34 PF: > { %p1632_p4 = scmp.ge.s32.totalorder %s2186_s25, 1  ;;  %p223_p5 = scmp.lt.s32.totalorder %s2186_s25, 9 }
  0x36   : > { %p224_p6 = pnand %p1632_p4, %p223_p5 }
  0x37   : > { %s229_s23 = sand.u32 (!%p224_p6), 1, %s2162_s19  }
  0x38   : > { %227 = sbr.rel (%p224_p6) target bundleno = 1296 (0x510), region = 36  ;;  %s1633_s10 = sshll.u32 (!%p224_p6), %s229_s23, 7 }
  0x39   : > { %s230_s26 = scalar_lea.sflag (!%p224_p6), [#allocation6], %s229_s23  ;;  %s2351_s30 = scalar_lea.vmem (!%p224_p6), [#allocation5], %s1633_s10 }
  0x3f   : > { %2137 = dma.done.wait (%p2301_p7), %s230_s26, 2048  }
  0x40   : > { %2139 = vsyncadd (%p2301_p7), %s230_s26, 4294965248  ;;  %s255_s24 = sand.u32 1, %s2150_s16   ;;  %p1635_p3 = scmp.ne.s32.totalorder %s2170_s21, 0 }
  0x41   : > { %s2360_s6 = sshll.u32 %s255_s24, 3  ;;  %vm264_vm0 = vcmask (!%p1635_p3), 7168   ;;  %v2194_v0 = vmov (!%p1635_p3), -inf   ;;  %v2195_v1 = vmov (!%p1635_p3), 0.0  }
  0x42   : > { %s257_s13 = scalar_lea.vmem [#allocation8], %s2360_s6  ;;  %263 = sbr.rel (%p1635_p3) target bundleno = 73 (0x49), region = 44  ;;  %265 = vst.msk [vmem:[#allocation2] sm:$0xff] (!%p1635_p3), %vm264_vm0, %v2194_v0  ;;  %266 = vst.msk [vmem:[#allocation3] sm:$0xff] (!%p1635_p3), %vm264_vm0, %v2195_v1 }
  0x43   : > { %267 = vst [vmem:[#allocation4] sm:$0xff] (!%p1635_p3), %v2195_v1 }
  0x49 PF: > { %v284_v2 = vld [vmem:[%s2856_s1] sm:$0xff]  ;;  %v285_v3 = vld [vmem:[%s2856_s1 + $0x8] sm:$0xff]  ;;  %v286_v4 = vld [vmem:[%s2856_s1 + $0x10] sm:$0xff]  ;;  %vm491_vm1 = vcmask 261120   ;;  %vm568_vm2 = vcmask 130112   ;;  %vm633_vm3 = vcmask 1041409  }
  0x4a   : > { %v1820_v5 = vpack.c.bf16 %v285_v3, %v284_v2  ;;  %v287_v6 = vld [vmem:[%s2856_s1 + $0x18] sm:$0xff]  ;;  %v288_v8 = vld [vmem:[%s2856_s1 + $0x20] sm:$0xff]  ;;  %v289_v9 = vld [vmem:[%s2856_s1 + $0x28] sm:$0xff]  ;;  %vm635_vm4 = vcmask 1042434   ;;  %vm637_vm5 = vcmask 1043459   ;;  %vm639_vm6 = vcmask 1044484  }
  0x4b   : > { %v1824_v7 = vpack.c.bf16 %v287_v6, %v286_v4  ;;  %v1828_v10 = vpack.c.bf16 %v289_v9, %v288_v8  ;;  %v290_v11 = vld [vmem:[%s2856_s1 + $0x30] sm:$0xff]  ;;  %v291_v12 = vld [vmem:[%s2856_s1 + $0x38] sm:$0xff]  ;;  %v2393_v14 = vld [vmem:[%s2351_s30 + $0x10] sm:$0xff]  ;;  %vm641_vm7 = vcmask 1045509   ;;  %vm643_vm8 = vcmask 1046534   ;;  %p1646_p7 = scmp.ne.s32.totalorder %s2170_s21, 3 }
  0x4c   : > { %1821 = vmatprep.subr.bf16.mxu0 %v1820_v5  ;;  %v2389_v13 = vld [vmem:[%s2351_s30] sm:$0xff]  ;;  %v2396_v15 = vld [vmem:[%s2351_s30 + $0x18] sm:$0xff]  ;;  %v2404_v18 = vld [vmem:[%s2351_s30 + $0x28] sm:$0xff]  ;;  %v1832_v27 = vpack.c.bf16 %v291_v12, %v290_v11  ;;  %vm645_vm9 = vcmask 1047559   ;;  %vm648_vm10 = vcmask 130048   ;;  %vm898_vm11 = vcmask 7168  }
  0x4d   : > { %1823 = vmatpush3.bf16.msra.mxu0 %v1820_v5  ;;  %1740 = vmatprep.mubr.f32.mxu0 %v2389_v13  ;;  %v2399_v16 = vld [vmem:[%s2351_s30 + $0x20] sm:$0xff]  ;;  %v1856_v17 = vpack.c.bf16 %v2396_v15, %v2393_v14  ;;  %v2407_v19 = vld [vmem:[%s2351_s30 + $0x30] sm:$0xff]  ;;  %v2410_v20 = vld [vmem:[%s2351_s30 + $0x38] sm:$0xff]  ;;  %vm2198_vm12 = vmmov 0  }
  0x4e   : > { %1825 = vmatprep.subr.bf16.mxu0 %v1824_v7  ;;  %v292_v21 = vld [vmem:[%s2856_s1 + $0x40] sm:$0xff]  ;;  %v1859_v22 = vpack.c.bf16 %v2404_v18, %v2399_v16  ;;  %v1862_v23 = vpack.c.bf16 %v2410_v20, %v2407_v19  ;;  %v2420_v24 = vld [vmem:[%s2351_s30 + $0x40] sm:$0xff]  ;;  %v2426_v26 = vld [vmem:[%s2351_s30 + $0x50] sm:$0xff] }
  0x4f   : > { %v2423_v25 = vld [vmem:[%s2351_s30 + $0x48] sm:$0xff]  ;;  %v2431_v29 = vld [vmem:[%s2351_s30 + $0x58] sm:$0xff]  ;;  %v2434_v30 = vld [vmem:[%s2351_s30 + $0x60] sm:$0xff] }
  0x50   : > { %v1865_v28 = vpack.c.bf16 %v2423_v25, %v2420_v24  ;;  %v2437_v31 = vld [vmem:[%s2351_s30 + $0x68] sm:$0xff]  ;;  %v293_v32 = vld [vmem:[%s2856_s1 + $0x48] sm:$0xff]  ;;  %v1868_v33 = vpack.c.bf16 %v2431_v29, %v2426_v26  ;;  %v2450_v36 = vld [vmem:[%s2351_s30 + $0x78] sm:$0xff] }
  0x51   : > { %1827 = vmatpush3.bf16.msra.mxu0 %v1824_v7  ;;  %v1871_v34 = vpack.c.bf16 %v2437_v31, %v2434_v30  ;;  %v2447_v35 = vld [vmem:[%s2351_s30 + $0x70] sm:$0xff]  ;;  %v1836_v38 = vpack.c.bf16 %v293_v32, %v292_v21  ;;  %v294_v39 = vld [vmem:[%s2856_s1 + $0x50] sm:$0xff]  ;;  %v295_v40 = vld [vmem:[%s2856_s1 + $0x58] sm:$0xff] }
  0x52   : > { %1829 = vmatprep.subr.bf16.mxu0 %v1828_v10  ;;  %v1874_v37 = vpack.c.bf16 %v2450_v36, %v2447_v35  ;;  %v1840_v41 = vpack.c.bf16 %v295_v40, %v294_v39  ;;  %v296_v42 = vld [vmem:[%s2856_s1 + $0x60] sm:$0xff]  ;;  %v297_v43 = vld [vmem:[%s2856_s1 + $0x68] sm:$0xff]  ;;  %v298_v45 = vld [vmem:[%s2856_s1 + $0x70] sm:$0xff] }
  0x53   : > { %v1844_v44 = vpack.c.bf16 %v297_v43, %v296_v42  ;;  %v299_v46 = vld [vmem:[%s2856_s1 + $0x78] sm:$0xff]  ;;  %v2473_v48 = vld [vmem:[%s2351_s30 + $0x8] sm:$0xff] }
  0x54   : > { %v1848_v47 = vpack.c.bf16 %v299_v46, %v298_v45  ;;  %v2493_v49 = vld [vmem:[%s2857_s2] ss:$0 sm:$0xff] }
  0x55   : > { %1831 = vmatpush3.bf16.msra.mxu0 %v1828_v10  ;;  %v2504_v62 = vld [vmem:[%s2858_s3] ss:$0 sm:$0xff] }
  0x56   : > { %1833 = vmatprep.subr.bf16.mxu0 %v1832_v27 }
  0x59   : > { %1835 = vmatpush3.bf16.msra.mxu0 %v1832_v27 }
  0x5a   : > { %1837 = vmatprep.subr.bf16.mxu0 %v1836_v38 }
  0x5d   : > { %1839 = vmatpush3.bf16.msra.mxu0 %v1836_v38 }
  0x5e   : > { %1841 = vmatprep.subr.bf16.mxu0 %v1840_v41 }
  0x61   : > { %1843 = vmatpush3.bf16.msra.mxu0 %v1840_v41 }
  0x62   : > { %1845 = vmatprep.subr.bf16.mxu0 %v1844_v44 }
  0x65   : > { %1847 = vmatpush3.bf16.msra.mxu0 %v1844_v44 }
  0x66   : > { %1849 = vmatprep.subr.bf16.mxu0 %v1848_v47 }
  0x69   : > { %1851 = vmatpush3.bf16.msra.mxu0 %v1848_v47 }
  0x6c   : > { %1741 = vmatmul.mubr.f32.vlgmr.msra.gmra.mrb[0].mxu0 %v2473_v48 }
  0x6d   : > { %1743 = vmatprep.mubr.f32.mxu0 %v2393_v14 }
  0x70   : > { %1744 = vmatmul.mubr.f32.gmra.mrb[2].mxu0 %v2396_v15 }
  0x71   : > { %1746 = vmatprep.mubr.f32.mxu0 %v2399_v16 }
  0x74   : > { %1747 = vmatmul.mubr.f32.gmra.mrb[4].mxu0 %v2404_v18 }
  0x75   : > { %1749 = vmatprep.mubr.f32.mxu0 %v2407_v19 }
  0x78   : > { %1750 = vmatmul.mubr.f32.gmra.mrb[6].mxu0 %v2410_v20 }
  0x79   : > { %1752 = vmatprep.mubr.f32.mxu0 %v2420_v24 }
  0x7c   : > { %1753 = vmatmul.mubr.f32.gmra.mrb[8].mxu0 %v2423_v25 }
  0x7d   : > { %1755 = vmatprep.mubr.f32.mxu0 %v2426_v26 }
  0x80   : > { %1756 = vmatmul.mubr.f32.gmra.mrb[10].mxu0 %v2431_v29 }
  0x81   : > { %1758 = vmatprep.mubr.f32.mxu0 %v2434_v30 }
  0x84   : > { %1759 = vmatmul.mubr.f32.gmra.mrb[12].mxu0 %v2437_v31 }
  0x85   : > { %1761 = vmatprep.mubr.f32.mxu0 %v2447_v35 }
  0x88   : > { %1762 = vmatmul.mubr.f32.gmra.mrb[14].mxu0 %v2450_v36 }
 0x13f   : > { %v1742_v50 = vpop.f32.mrb[0].mxu0 }
 0x140   : > { %v379_v51 = vadd.f32 %v1742_v50, %v2493_v49  ;;  %v373_v52 = vpop.f32.mrb[1].mxu0 }
 0x141   : > { %v374_v53 = vadd.f32 %v2493_v49, %v373_v52 }
 0x142   : > { %1995 = vtanh.f32 %v379_v51 }
 0x143   : > { %1997 = vtanh.f32 %v374_v53  ;;  %v1745_v54 = vpop.f32.mrb[2].mxu0 }
 0x144   : > { %v389_v55 = vadd.f32 %v1745_v54, %v2493_v49  ;;  %v383_v56 = vpop.f32.mrb[3].mxu0 }
 0x145   : > { %v384_v57 = vadd.f32 %v2493_v49, %v383_v56 }
 0x146   : > { %1999 = vtanh.f32 %v389_v55 }
 0x147   : > { %2001 = vtanh.f32 %v384_v57  ;;  %v1748_v58 = vpop.f32.mrb[4].mxu0 }
 0x148   : > { %v399_v59 = vadd.f32 %v1748_v58, %v2493_v49  ;;  %v393_v60 = vpop.f32.mrb[5].mxu0 }
 0x149   : > { %v394_v61 = vadd.f32 %v2493_v49, %v393_v60 }
 0x14a   : > { %2003 = vtanh.f32 %v399_v59 }
 0x14b   : > { %2005 = vtanh.f32 %v394_v61  ;;  %v1751_v63 = vpop.f32.mrb[6].mxu0 }
 0x14c   : > { %v1996_v0 = vpop.eup %1995  ;;  %v409_v1 = vadd.f32 %v1751_v63, %v2493_v49  ;;  %v403_v2 = vpop.f32.mrb[7].mxu0 }
 0x14d   : > { %v1998_v3 = vpop.eup %1997  ;;  %v404_v4 = vadd.f32 %v2493_v49, %v403_v2  ;;  %v476_v5 = vmul.f32 %v1996_v0, %v2504_v62 }
 0x14e   : > { %2007 = vtanh.f32 %v409_v1  ;;  %v475_v8 = vmul.f32 %v1998_v3, %v2504_v62 }
 0x14f   : > { %2009 = vtanh.f32 %v404_v4  ;;  %v495_v6 = vsel %vm491_vm1, %v476_v5, 0.0  ;;  %v1754_v7 = vpop.f32.mrb[8].mxu0 }
 0x150   : > { %v2000_v9 = vpop.eup %1999  ;;  %496 = vadd.xlane.f32.xlu0 %v495_v6  ;;  %v419_v10 = vadd.f32 %v1754_v7, %v2493_v49  ;;  %v413_v11 = vpop.f32.mrb[9].mxu0  ;;  %v492_v38 = vsel %vm491_vm1, %v475_v8, 0.0 }
 0x151   : > { %v2002_v12 = vpop.eup %2001  ;;  %v414_v21 = vadd.f32 %v2493_v49, %v413_v11  ;;  %v478_v27 = vmul.f32 %v2000_v9, %v2504_v62 }
 0x152   : > { %2011 = vtanh.f32 %v419_v10  ;;  %v477_v40 = vmul.f32 %v2002_v12, %v2504_v62 }
 0x153   : > { %2013 = vtanh.f32 %v414_v21  ;;  %v501_v32 = vsel %vm491_vm1, %v478_v27, 0.0  ;;  %v1757_v39 = vpop.f32.mrb[10].mxu0 }
 0x154   : > { %v2004_v41 = vpop.eup %2003  ;;  %502 = vadd.xlane.f32.xlu1 %v501_v32  ;;  %493 = vadd.xlane.f32.xlu0 %v492_v38  ;;  %v429_v42 = vadd.f32 %v1757_v39, %v2493_v49  ;;  %v423_v43 = vpop.f32.mrb[11].mxu0  ;;  %v498_v50 = vsel %vm491_vm1, %v477_v40, 0.0 }
 0x155   : > { %v2006_v44 = vpop.eup %2005  ;;  %v424_v45 = vadd.f32 %v2493_v49, %v423_v43  ;;  %v480_v46 = vmul.f32 %v2004_v41, %v2504_v62 }
 0x156   : > { %2015 = vtanh.f32 %v429_v42  ;;  %v479_v47 = vmul.f32 %v2006_v44, %v2504_v62 }
 0x157   : > { %2017 = vtanh.f32 %v424_v45  ;;  %v1760_v51 = vpop.f32.mrb[12].mxu0  ;;  %v507_v58 = vsel %vm491_vm1, %v480_v46, 0.0 }
 0x158   : > { %v2008_v52 = vpop.eup %2007  ;;  %499 = vadd.xlane.f32.xlu1 %v498_v50  ;;  %v439_v53 = vadd.f32 %v1760_v51, %v2493_v49  ;;  %v433_v54 = vpop.f32.mrb[13].mxu0  ;;  %v504_v55 = vsel %vm491_vm1, %v479_v47, 0.0 }
 0x159   : > { %v2010_v56 = vpop.eup %2009  ;;  %v434_v57 = vadd.f32 %v2493_v49, %v433_v54  ;;  %505 = vadd.xlane.f32.xlu0 %v504_v55  ;;  %v482_v59 = vmul.f32 %v2008_v52, %v2504_v62 }
 0x15a   : > { %2019 = vtanh.f32 %v439_v53  ;;  %v481_v60 = vmul.f32 %v2010_v56, %v2504_v62  ;;  %v557_v56 = vlaneseq }
 0x15b   : > { %2021 = vtanh.f32 %v434_v57  ;;  %v1763_v61 = vpop.f32.mrb[14].mxu0  ;;  %v513_v5 = vsel %vm491_vm1, %v482_v59, 0.0 }
 0x15c   : > { %v2012_v63 = vpop.eup %2011  ;;  %508 = vadd.xlane.f32.xlu1 %v507_v58  ;;  %v449_v0 = vadd.f32 %v1763_v61, %v2493_v49  ;;  %v443_v1 = vpop.f32.mrb[15].mxu0  ;;  %v510_v2 = vsel %vm491_vm1, %v481_v60, 0.0  ;;  %v558_v58 = vand.u32 127, %v557_v56  ;;  %v2566_v61 = vshrl.u32 %v557_v56, 7 }
 0x15d   : > { %v2014_v3 = vpop.eup %2013  ;;  %v444_v4 = vadd.f32 %v2493_v49, %v443_v1  ;;  %511 = vadd.xlane.f32.xlu0 %v510_v2  ;;  %v484_v6 = vmul.f32 %v2012_v63, %v2504_v62 }
 0x15e   : > { %2023 = vtanh.f32 %v449_v0  ;;  %v483_v7 = vmul.f32 %v2014_v3, %v2504_v62  ;;  %v563_v63 = vadd.s32 4294967288, %v558_v58  ;;  %v2571_v1 = vsub.s32 %v558_v58, %v2566_v61 }
 0x15f   : > { %2025 = vtanh.f32 %v444_v4  ;;  %v519_v11 = vsel %vm491_vm1, %v484_v6, 0.0 }
 0x160   : > { %v2016_v8 = vpop.eup %2015  ;;  %514 = vadd.xlane.f32.xlu1 %v513_v5  ;;  %v516_v9 = vsel %vm491_vm1, %v483_v7, 0.0  ;;  %v2576_v3 = vsub.s32 %v563_v63, %v2566_v61 }
 0x161   : > { %v2018_v10 = vpop.eup %2017  ;;  %517 = vadd.xlane.f32.xlu0 %v516_v9  ;;  %v486_v12 = vmul.f32 %v2016_v8, %v2504_v62 }
 0x162   : > { %v485_v49 = vmul.f32 %v2018_v10, %v2504_v62 }
 0x163   : > { %v525_v38 = vsel %vm491_vm1, %v486_v12, 0.0 }
 0x164   : > { %v2020_v21 = vpop.eup %2019  ;;  %520 = vadd.xlane.f32.xlu1 %v519_v11  ;;  %v522_v27 = vsel %vm491_vm1, %v485_v49, 0.0 }
 0x165   : > { %v2022_v32 = vpop.eup %2021  ;;  %523 = vadd.xlane.f32.xlu0 %v522_v27  ;;  %v488_v39 = vmul.f32 %v2020_v21, %v2504_v62 }
 0x166   : > { %v487_v40 = vmul.f32 %v2022_v32, %v2504_v62 }
 0x167   : > { %v531_v44 = vsel %vm491_vm1, %v488_v39, 0.0 }
 0x168   : > { %v2024_v41 = vpop.eup %2023  ;;  %526 = vadd.xlane.f32.xlu1 %v525_v38  ;;  %v528_v42 = vsel %vm491_vm1, %v487_v40, 0.0 }
 0x169   : > { %v2026_v43 = vpop.eup %2025  ;;  %529 = vadd.xlane.f32.xlu0 %v528_v42  ;;  %v490_v45 = vmul.f32 %v2024_v41, %v2504_v62 }
 0x16a   : > { %v489_v46 = vmul.f32 %v2026_v43, %v2504_v62 }
 0x16b   : > { %v537_v50 = vsel %vm491_vm1, %v490_v45, 0.0 }
 0x16c   : > { %532 = vadd.xlane.f32.xlu1 %v531_v44  ;;  %v534_v47 = vsel %vm491_vm1, %v489_v46, 0.0 }
 0x16d   : > { %535 = vadd.xlane.f32.xlu0 %v534_v47 }
 0x170   : > { %538 = vadd.xlane.f32.xlu1 %v537_v50 }
 0x1dd   : > { %v2548_v51 = vpop.xlane.xlu0 %496 }
 0x1de   : > { %v567_v27 = vrot.slane %v2548_v51, %v2576_v3 }
 0x1e1   : > { %v2550_v52 = vpop.xlane.xlu1 %502  ;;  %v2552_v53 = vpop.xlane.xlu0 %493 }
 0x1e2   : > { %v577_v8 = vrot.slane %v2550_v52, %v2576_v3  ;;  %v562_v9 = vrot.slane %v2552_v53, %v2571_v1 }
 0x1e4   : > { %v569_v43 = vsel %vm568_vm2, %v567_v27, %v562_v9 }
 0x1e5   : > { %v2554_v54 = vpop.xlane.xlu1 %499 }
 0x1e6   : > { %v2556_v55 = vpop.xlane.xlu0 %505  ;;  %v573_v4 = vrot.slane %v2554_v54, %v2571_v1 }
 0x1e7   : > { %v582_v5 = vrot.slane %v2556_v55, %v2571_v1 }
 0x1e8   : > { %v578_v32 = vsel %vm568_vm2, %v577_v8, %v573_v4 }
 0x1e9   : > { %v2558_v57 = vpop.xlane.xlu1 %508  ;;  %v634_v47 = vsel %vm633_vm3, %v578_v32, %v569_v43  ;;  %v2196_v32 = vmov 0   ;;  %v2197_v43 = vmov 0.0|0.0  }
 0x1ea   : > { %v2560_v62 = vpop.xlane.xlu0 %511  ;;  %v586_v6 = vrot.slane %v2558_v57, %v2576_v3  ;;  %1993 = vset.pattern.permute.xlu1 %v2196_v32  ;;  %1994 = vset.pattern.permute.xlu0 %v2196_v32 }
 0x1eb   : > { %v591_v10 = vrot.slane %v2560_v62, %v2571_v1  ;;  %1852 = vmatprep.subr.bf16.mxu1 %v2197_v43 }
 0x1ec   : > { %v587_v40 = vsel %vm568_vm2, %v586_v6, %v582_v5 }
 0x1ed   : > { %v2562_v59 = vpop.xlane.xlu1 %514  ;;  %v636_v56 = vsel %vm635_vm4, %v587_v40, %v634_v47 }
 0x1ee   : > { %v2564_v60 = vpop.xlane.xlu0 %517  ;;  %v595_v11 = vrot.slane %v2562_v59, %v2576_v3 }
 0x1ef   : > { %v600_v49 = vrot.slane %v2564_v60, %v2571_v1 }
 0x1f0   : > { %v596_v44 = vsel %vm568_vm2, %v595_v11, %v591_v10 }
 0x1f1   : > { %v2568_v0 = vpop.xlane.xlu1 %520  ;;  %v638_v4 = vsel %vm637_vm5, %v596_v44, %v636_v56  ;;  %v662_v44 = vsub.s32 0, %v2566_v61  ;;  %v678_v56 = vsub.s32 4, %v2566_v61 }
 0x1f2   : > { %v2573_v2 = vpop.xlane.xlu0 %523  ;;  %v604_v21 = vrot.slane %v2568_v0, %v2576_v3 }
 0x1f3   : > { %v609_v38 = vrot.slane %v2573_v2, %v2571_v1 }
 0x1f4   : > { %v605_v50 = vsel %vm568_vm2, %v604_v21, %v600_v49 }
 0x1f5   : > { %v2584_v7 = vpop.xlane.xlu1 %526  ;;  %v640_v9 = vsel %vm639_vm6, %v605_v50, %v638_v4 }
 0x1f6   : > { %v2594_v12 = vpop.xlane.xlu0 %529  ;;  %v613_v39 = vrot.slane %v2584_v7, %v2576_v3 }
 0x1f7   : > { %v618_v41 = vrot.slane %v2594_v12, %v2571_v1 }
 0x1f8   : > { %v614_v58 = vsel %vm568_vm2, %v613_v39, %v609_v38  ;;  %v2636_v38 = vld [vmem:[#allocation2] sm:$0xff] }
 0x1f9   : > { %v2610_v42 = vpop.xlane.xlu1 %532  ;;  %v642_v10 = vsel %vm641_vm7, %v614_v58, %v640_v9 }
 0x1fa   : > { %v622_v45 = vrot.slane %v2610_v42, %v2576_v3  ;;  %v2616_v46 = vpop.xlane.xlu0 %535 }
 0x1fb   : > { %v627_v63 = vrot.slane %v2616_v46, %v2571_v1 }
 0x1fc   : > { %v623_v6 = vsel %vm568_vm2, %v622_v45, %v618_v41  ;;  %v666_v45 = vsub.s32 1, %v2566_v61 }
 0x1fd   : > { %v2625_v5 = vpop.xlane.xlu1 %538  ;;  %v644_v49 = vsel %vm643_vm8, %v623_v6, %v642_v10  ;;  %v670_v6 = vsub.s32 2, %v2566_v61 }
 0x1fe   : > { %v631_v8 = vrot.slane %v2625_v5, %v2576_v3 }
 0x200   : > { %v632_v11 = vsel %vm568_vm2, %v631_v8, %v627_v63  ;;  %v682_v8 = vsub.s32 5, %v2566_v61 }
 0x201   : > { %v646_v21 = vsel %vm645_vm9, %v632_v11, %v644_v49 }
 0x202   : > { %v649_v27 = vsel %vm648_vm10, %v646_v21, -inf  ;;  %v686_v21 = vsub.s32 6, %v2566_v61 }
 0x203   : > { %650 = vmax.xlane.f32.xlu0 %v649_v27 }
 0x290   : > { %v651_v39 = vpop.xlane.xlu0 %650 }
 0x291   : > { %v2639_v40 = vmax.f32 %v2636_v38, %v651_v39 }
 0x293   : > { %v653_v41 = vsub.f32 %v2636_v38, %v2639_v40  ;;  %1508 = vst.msk [vmem:[#allocation2] sm:$0xff] %vm898_vm11, %v2639_v40  ;;  %658 = vperm.xlu1 %1993, %v2639_v40  }
 0x312   : > { %v659_v47 = vpop.permute.xlu1 %658 }
 0x313   : > { %v663_v50 = vrot.slane %v659_v47, %v662_v44  ;;  %v667_v58 = vrot.slane %v659_v47, %v666_v45  ;;  %v2654_v9 = vrot.slane %v659_v47, %v678_v56  ;;  %v671_v27 = vrot.slane %v659_v47, %v670_v6 }
 0x314   : > { %v2659_v39 = vrot.slane %v659_v47, %v682_v8  ;;  %v674_v44 = vsub.s32 3, %v2566_v61  ;;  %v690_v45 = vsub.s32 7, %v2566_v61  ;;  %v2666_v56 = vrot.slane %v659_v47, %v686_v21 }
 0x315   : > { %v700_v63 = vsub.f32 %v2552_v53, %v663_v50  ;;  %v701_v4 = vsub.f32 %v2548_v51, %v663_v50  ;;  %v702_v10 = vsub.f32 %v2554_v54, %v667_v58  ;;  %v703_v32 = vsub.f32 %v2550_v52, %v667_v58 }
 0x316   : > { %v709_v51 = vsub.f32 %v2568_v0, %v2654_v9  ;;  %v704_v54 = vsub.f32 %v2556_v55, %v671_v27  ;;  %v711_v52 = vsub.f32 %v2584_v7, %v2659_v39  ;;  %v2671_v6 = vrot.slane %v659_v47, %v690_v45 }
 0x317   : > { %v716_v11 = vmul.f32 1.442695, %v700_v63  ;;  %v718_v49 = vmul.f32 1.442695, %v701_v4  ;;  %v720_v53 = vmul.f32 1.442695, %v702_v10  ;;  %v675_v63 = vrot.slane %v659_v47, %v674_v44 }
 0x318   : > { %v722_v50 = vmul.f32 1.442695, %v703_v32  ;;  %v734_v58 = vmul.f32 1.442695, %v709_v51  ;;  %v705_v4 = vsub.f32 %v2558_v57, %v671_v27  ;;  %v724_v0 = vmul.f32 1.442695, %v704_v54 }
 0x319   : > { %2027 = vpow2.f32 %v716_v11  ;;  %v713_v61 = vsub.f32 %v2610_v42, %v2666_v56  ;;  %v738_v55 = vmul.f32 1.442695, %v711_v52  ;;  %v706_v11 = vsub.f32 %v2560_v62, %v675_v63 }
 0x31a   : > { %2029 = vpow2.f32 %v718_v49  ;;  %v726_v49 = vmul.f32 1.442695, %v705_v4  ;;  %v1853_v57 = vpack.c.bf16 %v2473_v48, %v2389_v13  ;;  %v715_v7 = vsub.f32 %v2625_v5, %v2671_v6 }
 0x31b   : > { %2031 = vpow2.f32 %v720_v53  ;;  %v742_v47 = vmul.f32 1.442695, %v713_v61  ;;  %v2199_v42 = vmov 0.0   ;;  %v728_v62 = vmul.f32 1.442695, %v706_v11 }
 0x31c   : > { %2033 = vpow2.f32 %v722_v50  ;;  %1768 = vmatprep.mubr.msk.f32.mxu1 %vm2198_vm12, %v2199_v42  ;;  %1854 = vmatpush3.bf16.msra.mxu1 %v1853_v57  ;;  %v707_v27 = vsub.f32 %v2562_v59, %v675_v63  ;;  %v746_v13 = vmul.f32 1.442695, %v715_v7  ;;  %v654_v32 = vmul.f32 1.442695, %v653_v41 }
 0x31d   : > { %2035 = vpow2.f32 %v734_v58  ;;  %1855 = vmatprep.subr.bf16.mxu1 %v2197_v43  ;;  %v708_v51 = vsub.f32 %v2564_v60, %v2654_v9  ;;  %v710_v59 = vsub.f32 %v2573_v2, %v2659_v39  ;;  %v712_v41 = vsub.f32 %v2594_v12, %v2666_v56 }
 0x31e   : > { %2037 = vpow2.f32 %v724_v0  ;;  %v730_v53 = vmul.f32 1.442695, %v707_v27  ;;  %v714_v52 = vsub.f32 %v2616_v46, %v2671_v6 }
 0x31f   : > { %2039 = vpow2.f32 %v738_v55  ;;  %v732_v54 = vmul.f32 1.442695, %v708_v51  ;;  %v736_v60 = vmul.f32 1.442695, %v710_v59  ;;  %v740_v2 = vmul.f32 1.442695, %v712_v41 }
 0x320   : > { %2041 = vpow2.f32 %v726_v49  ;;  %v744_v63 = vmul.f32 1.442695, %v714_v52 }
 0x321   : > { %2043 = vpow2.f32 %v742_v47 }
 0x322   : > { %2045 = vpow2.f32 %v728_v62 }
 0x323   : > { %v2028_v8 = vpop.eup %2027  ;;  %2047 = vpow2.f32 %v746_v13 }
 0x324   : > { %v2030_v10 = vpop.eup %2029  ;;  %767 = vperm.xlu0 %1994, %v2028_v8   ;;  %2049 = vpow2.f32 %v654_v32 }
 0x325   : > { %770 = vperm.xlu1 %1993, %v2030_v10   ;;  %v2032_v21 = vpop.eup %2031  ;;  %2051 = vpow2.f32 %v730_v53 }
 0x326   : > { %v2034_v48 = vpop.eup %2033  ;;  %2053 = vpow2.f32 %v732_v54 }
 0x327   : > { %v2036_v5 = vpop.eup %2035  ;;  %2055 = vpow2.f32 %v736_v60 }
 0x328   : > { %794 = vperm.xlu0 %1994, %v2036_v5   ;;  %v2038_v44 = vpop.eup %2037  ;;  %2057 = vpow2.f32 %v740_v2 }
 0x329   : > { %773 = vperm.xlu1 %1993, %v2032_v21   ;;  %v2040_v45 = vpop.eup %2039  ;;  %2059 = vpow2.f32 %v744_v63 }
 0x32a   : > { %v2042_v38 = vpop.eup %2041 }
 0x32b   : > { %v2044_v40 = vpop.eup %2043 }
 0x32c   : > { %800 = vperm.xlu0 %1994, %v2040_v45   ;;  %v2046_v9 = vpop.eup %2045 }
 0x32d   : > { %776 = vperm.xlu1 %1993, %v2034_v48   ;;  %v2048_v50 = vpop.eup %2047 }
 0x32e   : > { %v2695_v39 = vpop.eup %2049 }
 0x32f   : > { %v2052_v58 = vpop.eup %2051 }
 0x330   : > { %806 = vperm.xlu0 %1994, %v2044_v40   ;;  %v2054_v12 = vpop.eup %2053 }
 0x331   : > { %779 = vperm.xlu1 %1993, %v2038_v44   ;;  %v2056_v56 = vpop.eup %2055 }
 0x332   : > { %v2058_v4 = vpop.eup %2057 }
 0x333   : > { %v2060_v0 = vpop.eup %2059 }
 0x334   : > { %812 = vperm.xlu0 %1994, %v2048_v50  }
 0x335   : > { %782 = vperm.xlu1 %1993, %v2042_v38  }
 0x338   : > { %1479 = vperm.xlu0 %1994, %v2695_v39  }
 0x339   : > { %785 = vperm.xlu1 %1993, %v2046_v9  }
 0x33d   : > { %788 = vperm.xlu1 %1993, %v2052_v58  }
 0x341   : > { %791 = vperm.xlu1 %1993, %v2054_v12  }
 0x345   : > { %797 = vperm.xlu1 %1993, %v2056_v56  }
 0x349   : > { %803 = vperm.xlu1 %1993, %v2058_v4  }
 0x34d   : > { %809 = vperm.xlu1 %1993, %v2060_v0  }
 0x3a3   : > { %v768_v46 = vpop.permute.xlu0 %767 }
 0x3a4   : > { %v771_v6 = vpop.permute.xlu1 %770  ;;  %v817_v61 = vrot.slane %v768_v46, %v2571_v1 }
 0x3a5   : > { %v821_v55 = vrot.slane %v771_v6, %v2576_v3 }
 0x3a7   : > { %v822_v8 = vsel %vm568_vm2, %v821_v55, %v817_v61  ;;  %v795_v62 = vpop.permute.xlu0 %794 }
 0x3a8   : > { %v774_v10 = vpop.permute.xlu1 %773  ;;  %1769 = vmatmul.mubr.msk.f32.vlgmr.msra.gmra.mrb[0].mxu1 %vm648_vm10, %v822_v8  ;;  %v857_v32 = vrot.slane %v795_v62, %v2576_v3 }
 0x3a9   : > { %1857 = vmatpush3.bf16.msra.mxu1 %v1856_v17  ;;  %1775 = vmatprep.mubr.msk.f32.mxu1 %vm2198_vm12, %v2199_v42  ;;  %v826_v49 = vrot.slane %v774_v10, %v2571_v1 }
 0x3aa   : > { %1858 = vmatprep.subr.bf16.mxu1 %v2197_v43 }
 0x3ab   : > { %v801_v13 = vpop.permute.xlu0 %800 }
 0x3ac   : > { %v777_v11 = vpop.permute.xlu1 %776  ;;  %v866_v53 = vrot.slane %v801_v13, %v2576_v3 }
 0x3ad   : > { %v830_v57 = vrot.slane %v777_v11, %v2576_v3 }
 0x3af   : > { %v831_v7 = vsel %vm568_vm2, %v830_v57, %v826_v49 }
 0x3b0   : > { %v780_v47 = vpop.permute.xlu1 %779  ;;  %1776 = vmatmul.mubr.msk.f32.vlgmr.msra.gmra.mrb[2].mxu1 %vm648_vm10, %v831_v7  ;;  %v886_v26 = vsel %vm633_vm3, %v831_v7, %v822_v8 }
 0x3b1   : > { %1860 = vmatpush3.bf16.msra.mxu1 %v1859_v22  ;;  %1782 = vmatprep.mubr.msk.f32.mxu1 %vm2198_vm12, %v2199_v42  ;;  %v835_v15 = vrot.slane %v780_v47, %v2571_v1 }
 0x3b2   : > { %1861 = vmatprep.subr.bf16.mxu1 %v2197_v43 }
 0x3b4   : > { %v783_v14 = vpop.permute.xlu1 %782 }
 0x3b5   : > { %v839_v17 = vrot.slane %v783_v14, %v2576_v3 }
 0x3b7   : > { %v840_v21 = vsel %vm568_vm2, %v839_v17, %v835_v15  ;;  %v1476_v17 = vld [vmem:[#allocation4] sm:$0xff] }
 0x3b8   : > { %v786_v27 = vpop.permute.xlu1 %785  ;;  %1783 = vmatmul.mubr.msk.f32.vlgmr.msra.gmra.mrb[4].mxu1 %vm648_vm10, %v840_v21 }
 0x3b9   : > { %1863 = vmatpush3.bf16.msra.mxu1 %v1862_v23  ;;  %1789 = vmatprep.mubr.msk.f32.mxu1 %vm2198_vm12, %v2199_v42  ;;  %v844_v18 = vrot.slane %v786_v27, %v2571_v1  ;;  %v807_v23 = vpop.permute.xlu0 %806 }
 0x3ba   : > { %1864 = vmatprep.subr.bf16.mxu1 %v2197_v43 }
 0x3bc   : > { %v789_v16 = vpop.permute.xlu1 %788 }
 0x3bd   : > { %v848_v22 = vrot.slane %v789_v16, %v2576_v3  ;;  %v813_v29 = vpop.permute.xlu0 %812 }
 0x3be   : > { %v884_v30 = vrot.slane %v813_v29, %v2576_v3 }
 0x3bf   : > { %v849_v48 = vsel %vm568_vm2, %v848_v22, %v844_v18 }
 0x3c0   : > { %v792_v5 = vpop.permute.xlu1 %791  ;;  %1790 = vmatmul.mubr.msk.f32.vlgmr.msra.gmra.mrb[6].mxu1 %vm648_vm10, %v849_v48 }
 0x3c1   : > { %v853_v19 = vrot.slane %v792_v5, %v2571_v1  ;;  %1866 = vmatpush3.bf16.msra.mxu1 %v1865_v28  ;;  %1796 = vmatprep.mubr.msk.f32.mxu1 %vm2198_vm12, %v2199_v42  ;;  %v875_v28 = vrot.slane %v807_v23, %v2576_v3 }
 0x3c2   : > { %1867 = vmatprep.subr.bf16.mxu1 %v2197_v43 }
 0x3c3   : > { %v858_v20 = vsel %vm568_vm2, %v857_v32, %v853_v19  ;;  %v2200_v32 = vmov (!%p1646_p7), 0  }
 0x3c4   : > { %v798_v51 = vpop.permute.xlu1 %797  ;;  %1797 = vmatmul.mubr.msk.f32.vlgmr.msra.gmra.mrb[8].mxu1 %vm648_vm10, %v858_v20  ;;  %2061 = vset.pattern.permute.xlu0 (!%p1646_p7), %v2200_v32 }
 0x3c5   : > { %v862_v44 = vrot.slane %v798_v51, %v2571_v1  ;;  %1869 = vmatpush3.bf16.msra.mxu1 %v1868_v33  ;;  %1803 = vmatprep.mubr.msk.f32.mxu1 %vm2198_vm12, %v2199_v42  ;;  %v887_v33 = vsel %vm635_vm4, %v840_v21, %v886_v26  ;;  %v1480_v21 = vpop.permute.xlu0 %1479 }
 0x3c6   : > { %1870 = vmatprep.subr.bf16.mxu1 %v2197_v43  ;;  %v888_v54 = vsel %vm637_vm5, %v849_v48, %v887_v33  ;;  %v1482_v22 = vmul.f32 %v1480_v21, %v1476_v17 }
 0x3c7   : > { %v867_v24 = vsel %vm568_vm2, %v866_v53, %v862_v44  ;;  %v889_v31 = vsel %vm639_vm6, %v858_v20, %v888_v54 }
 0x3c8   : > { %v804_v25 = vpop.permute.xlu1 %803  ;;  %1804 = vmatmul.mubr.msk.f32.vlgmr.msra.gmra.mrb[10].mxu1 %vm648_vm10, %v867_v24 }
 0x3c9   : > { %v871_v45 = vrot.slane %v804_v25, %v2571_v1  ;;  %1872 = vmatpush3.bf16.msra.mxu1 %v1871_v34  ;;  %1810 = vmatprep.mubr.msk.f32.mxu1 %vm2198_vm12, %v2199_v42 }
 0x3ca   : > { %1873 = vmatprep.subr.bf16.mxu1 %v2197_v43  ;;  %v890_v43 = vsel %vm641_vm7, %v867_v24, %v889_v31 }
 0x3cb   : > { %v876_v59 = vsel %vm568_vm2, %v875_v28, %v871_v45 }
 0x3cc   : > { %v810_v38 = vpop.permute.xlu1 %809  ;;  %1811 = vmatmul.mubr.msk.f32.vlgmr.msra.gmra.mrb[12].mxu1 %vm648_vm10, %v876_v59  ;;  %v891_v41 = vsel %vm643_vm8, %v876_v59, %v890_v43 }
 0x3cd   : > { %v880_v34 = vrot.slane %v810_v38, %v2571_v1  ;;  %1875 = vmatpush3.bf16.msra.mxu1 %v1874_v37  ;;  %1817 = vmatprep.mubr.msk.f32.mxu1 %vm2198_vm12, %v2199_v42  ;;  %v748_v1 = vld [vmem:[#allocation3] sm:$0xff] }
 0x3ce   : > { %v749_v35 = vmul.f32 %v2695_v39, %v748_v1 }
 0x3cf   : > { %v885_v40 = vsel %vm568_vm2, %v884_v30, %v880_v34 }
 0x3d0   : > { %1818 = vmatmul.mubr.msk.f32.vlgmr.msra.gmra.mrb[14].mxu1 %vm648_vm10, %v885_v40  ;;  %v892_v3 = vsel %vm645_vm9, %v885_v40, %v891_v41 }
 0x3d1   : > { %v894_v60 = vsel %vm648_vm10, %v892_v3, 0.0 }
 0x3d2   : > { %895 = vadd.xlane.f32.xlu1 %v894_v60 }
 0x45f   : > { %v896_v36 = vpop.xlane.xlu1 %895 }
 0x460   : > { %v897_v37 = vadd.f32 %v896_v36, %v749_v35 }
 0x462   : > { %899 = vst.msk [vmem:[#allocation3] sm:$0xff] %vm898_vm11, %v897_v37 }
 0x469   : > { %v1514_v5 = vld [vmem:[#allocation3] sm:$0xff] (!%p1646_p7) }
 0x46a   : > { %1517 = vperm.xlu0 (!%p1646_p7), %2061, %v1514_v5  }
 0x47b   : > { %v968_v42 = vpop.f32.mrb[0].mxu1 }
 0x47c   : > { %v1770_v9 = vpop.f32.mrb[1].mxu1 }
 0x483   : > { %v1040_v50 = vpop.f32.mrb[2].mxu1 }
 0x484   : > { %v1491_v52 = vrot.slane %v1040_v50, 7  ;;  %v1777_v2 = vpop.f32.mrb[3].mxu1 }
 0x486   : > { %v1492_v58 = vsel %vm633_vm3, %v1491_v52, %v968_v42 }
 0x48b   : > { %v1112_v63 = vpop.f32.mrb[4].mxu1 }
 0x48c   : > { %v1493_v12 = vrot.slane %v1112_v63, 6  ;;  %v1784_v56 = vpop.f32.mrb[5].mxu1 }
 0x48e   : > { %v1494_v4 = vsel %vm635_vm4, %v1493_v12, %v1492_v58 }
 0x493   : > { %v1184_v0 = vpop.f32.mrb[6].mxu1 }
 0x494   : > { %v1495_v46 = vrot.slane %v1184_v0, 5  ;;  %v1791_v6 = vpop.f32.mrb[7].mxu1 }
 0x496   : > { %v1496_v39 = vsel %vm637_vm5, %v1495_v46, %v1494_v4 }
 0x497   : > { %v1256_v61 = vpop.f32.mrb[8].mxu1 }
 0x498   : > { %v1497_v55 = vrot.slane %v1256_v61, 4  ;;  %v1798_v8 = vpop.f32.mrb[9].mxu1 }
 0x49a   : > { %v1498_v10 = vsel %vm639_vm6, %v1497_v55, %v1496_v39 }
 0x49b   : > { %v1328_v11 = vpop.f32.mrb[10].mxu1 }
 0x49c   : > { %v1499_v49 = vrot.slane %v1328_v11, 3  ;;  %v1805_v57 = vpop.f32.mrb[11].mxu1 }
 0x49e   : > { %v1500_v7 = vsel %vm641_vm7, %v1499_v49, %v1498_v10 }
 0x49f   : > { %v1400_v47 = vpop.f32.mrb[12].mxu1 }
 0x4a0   : > { %v1501_v14 = vrot.slane %v1400_v47, 2  ;;  %v1812_v15 = vpop.f32.mrb[13].mxu1 }
 0x4a2   : > { %v1502_v62 = vsel %vm643_vm8, %v1501_v14, %v1500_v7 }
 0x4a3   : > { %v1472_v27 = vpop.f32.mrb[14].mxu1  ;;  %1512 = sbr.rel (%p1646_p7) target bundleno = 1272 (0x4f8), region = 48 }
 0x4a4   : > { %v1503_v16 = vrot.slane %v1472_v27, 1  ;;  %v1819_v18 = vpop.f32.mrb[15].mxu1 }
 0x4a6   : > { %v1504_v13 = vsel %vm645_vm9, %v1503_v16, %v1502_v62 }
 0x4a7   : > { %v1506_v48 = vadd.f32 %v1504_v13, %v1482_v22 }
 0x4a9   : > { %1507 = vst [vmem:[#allocation4] sm:$0xff] %v1506_v48 }
 0x4b0   : > { %v1513_v20 = vld [vmem:[#allocation4] sm:$0xff] }
 0x4e9   : > { %v1518_v19 = vpop.permute.xlu0 %1517 }
 0x4ea   : > { %2062 = vrcp.f32 %v1518_v19 }
 0x4f4   : > { %v2063_v23 = vpop.eup %2062 }
 0x4f5   : > { %v1521_v51 = vmul.f32 %v2063_v23, %v1513_v20 }
 0x4f7   : > { %1522 = vst [vmem:[%s257_s13] sm:$0xff] %v1521_v51 }
 0x4f8 PF: > { %s1648_s26 = sshll.u32 %s2174_s22, 7  ;;  %s1537_s9 = sshll.u32 %s257_s13, 4  ;;  %s1538_s9 = int_to_ptr.vmem [resolvable:$true] %s1537_s9 }
 0x4f9   : > { %s2795_s18 = scalar_lea.hbm %s2859_s4, %s1648_s26  ;;  %s1524_s5 = scalar_lea.sflag [#allocation7], %s255_s24 }
 0x4fa   : > { %s2064_s27 = scalar_lea.vmem %s1538_s9, 128  ;;  %s2201_s7 = smov [#allocation8]  }
 0x4fb   : > { %p2065_p8 = scmp.ne.s32.totalorder %s1538_s9, %s2064_s27  ;;  %s2068_s28 = sshll.u32 %s2201_s7, 4  ;;  %s2069_s28 = int_to_ptr.vmem [resolvable:$false] %s2068_s28 }
 0x4fc   : > { %s2070_s29 = scalar_lea.vmem %s2069_s28, 256  ;;  %p2071_p11 = scmp.lt.s32.totalorder %s1538_s9, %s2069_s28 }
 0x4fd   : > { %p2066_p9 = pnand %p2065_p8, %p2309_p12  ;;  %p2072_p13 = scmp.lt.s32.totalorder %s2070_s29, %s2064_s27 }
 0x4ff   : > { %p2067_p10 = pneg %p2066_p9  ;;  %p2073_p0 = por %p2072_p13, %p2071_p11 }
 0x501   : > { %p2074_p2 = pnand %p2073_p0, %p2067_p10 }
 0x503   : > { %2077 = shalt.err (!%p2074_p2)
}
 0x504   : > { %s2078_s22 = scalar_lea.hbm %s2795_s18, 128  ;;  %s2082_s13 = scalar_lea.hbm %s2859_s4, 256 }
 0x505   : > { %p2079_p4 = scmp.ne.s32.totalorder %s2795_s18, %s2078_s22  ;;  %p2083_p3 = scmp.lt.u32.totalorder %s2795_s18, %s2859_s4 }
 0x506   : > { %p2084_p7 = scmp.lt.u32.totalorder %s2082_s13, %s2078_s22  ;;  %p2086_p9 = scmp.lt.u32.totalorder %s2078_s22, %s2795_s18 }
 0x507   : > { %p2080_p5 = pnand %p2079_p4, %p2309_p12 }
 0x508   : > { %p2085_p8 = por %p2084_p7, %p2083_p3 }
 0x509   : > { %p2081_p6 = pneg %p2080_p5 }
 0x50a   : > { %p2087_p10 = por %p2086_p9, %p2085_p8 }
 0x50c   : > { %p2088_p11 = pnand %p2087_p10, %p2081_p6 }
 0x50e   : > { %2091 = shalt.err (!%p2088_p11)
}
 0x50f   : > { %1885 = dma.vmem_to_hbm [thread:$0]  (%p2309_p12), %s1538_s9, 128, %s2795_s18, %s1524_s5  }
 0x510 PF: > { %p1891_p13 = scmp.ge.s32.totalorder %s2186_s25, 2  ;;  %s1549_s23 = sand.u32 1, %s2146_s15  }
 0x511   : > { %s1550_s10 = scalar_lea.sflag [#allocation7], %s1549_s23 }
 0x512   : > { %p1888_p0 = pnand %p1891_p13, %p2321_p1 }
 0x514   : > { %2141 = dma.done.wait (!%p1888_p0), %s1550_s10, 128  }
 0x515   : > { %2143 = vsyncadd (!%p1888_p0), %s1550_s10, 4294967168  ;;  %s20_s25 = sadd.s32 1, %s2186_s25   ;;  %s2874_s26 = sld [smem:[#allocation18_spill]] }
 0x516   : > { %p17_p2 = scmp.ge.s32.totalorder %s20_s25, 10   ;;  %s2875_s11 = sld [smem:[#allocation19_spill]] }
 0x517   : > { %s2876_s21 = sld [smem:[#allocation14_spill]]  ;;  %s2877_s22 = sld [smem:[#allocation15_spill]] }
 0x518   : > { %s2878_s23 = sld [smem:[#allocation16_spill]]  ;;  %s2879_s24 = sld [smem:[#allocation17_spill]] }
 0x519   : > { %s2880_s15 = smov %s2150_s16  ;;  %s2881_s16 = smov %s2154_s17 }
 0x51a   : > { %s2883_s18 = smov %s2162_s19  ;;  %s2884_s19 = smov %s2166_s20 }
 0x51b   : > { %s2882_s17 = smov %s2874_s26  ;;  %19 = sbr.rel (!%p17_p2) target bundleno = 9 (0x9), region = 94 }
 0x51c   : > { %s2885_s20 = smov %s2875_s11 }
 0x522   :  { %1555 = vsyncpa [#allocation6], 1 }
 0x523   :  { %1557 = vsyncpa [#allocation6 + $0x1], 1 }
 0x524   :  { %1558 = vsyncpa [#allocation7], 1 }
 0x525   :  { %1560 = vsyncpa [#allocation7 + $0x1], 1 }

</bundles_post_ra>
